<compile_context>
chip_gen: v7x
topology: tpu7x:2x2x1
jax: 0.10.0
libtpu: 0.0.40
codegen_flags: <defaults>
</compile_context>

<pallas_src>
import jax
import jax.numpy as jnp
import numpy as np
from jax import lax
from jax.experimental import pallas as pl
from jax.experimental.pallas import tpu as pltpu


# ------------------------------------------------------------------ helpers --
def _round_up(x, m):
    return ((x + m - 1) // m) * m


def _gram_xxt(x):
    # x @ x.T without materializing the transpose: contract both operands on
    # their last (lane) dim; feeds the MXU directly, accumulate in f32.
    return lax.dot_general(
        x, x,
        dimension_numbers=(((1,), (1,)), ((), ())),
        preferred_element_type=jnp.float32)


def _offdiag_mask(n):
    row = lax.broadcasted_iota(jnp.int32, (n, n), 0)
    col = lax.broadcasted_iota(jnp.int32, (n, n), 1)
    return (row != col).astype(jnp.float32)


def _double_center(g, n):
    # Batch-mean centering applied to the *gram*:  H G H with H = I - 11^T/n,
    # mathematically identical to centering the data before the gram but it
    # stays entirely in f32 (no re-rounding of centered values to bf16).
    # NOTE: g is exactly symmetric here (identical lhs/rhs operand, same
    # accumulation order), so row sums == column sums; using both orientations
    # avoids a lane<->sublane transpose.  Do NOT reuse for non-symmetric g.
    col_means = jnp.sum(g, axis=0, keepdims=True) / float(n)   # (1, N)
    row_means = jnp.sum(g, axis=1, keepdims=True) / float(n)   # (N, 1)
    total = jnp.sum(col_means) / float(n)                      # grand mean
    return g - row_means - col_means + total


def _hsic_center(g, n, offdiag):
    # Unbiased-HSIC style centering (matches the PyTorch center_gram).
    g = g * offdiag                                            # subtract_diag
    # Same symmetry note as _double_center.
    col_means = jnp.sum(g, axis=0, keepdims=True) / float(n - 2)
    row_means = jnp.sum(g, axis=1, keepdims=True) / float(n - 2)
    tot = jnp.sum(col_means) / float(2 * (n - 1))
    g = g - (row_means - tot) - (col_means - tot)
    g = g * offdiag                                            # subtract_diag
    return g


# ------------------------------------------------------------------- kernel --
def _make_cka_kernel(n, d1, tk):
    mask_tail = (d1 % tk) != 0   # baked at trace time

    def kernel(target_ref, feats_ref, embed_hbm_ref,          # inputs
               cka_ref, loss_ref,                             # outputs (SMEM)
               acc_ref, esim_ref, embed_vmem, fro_e_ref):     # scratch
        k = pl.program_id(0)

        # ---- k == 0: init accumulator, fetch embed once, and run the entire
        # embed half of the epilogue here so it hides under the (much longer)
        # feats HBM stream instead of sitting in the serial tail.
        @pl.when(k == 0)
        def _prologue():
            acc_ref[...] = jnp.zeros_like(acc_ref)
            pltpu.sync_copy(embed_hbm_ref, embed_vmem)        # fetch-once
            ge = _gram_xxt(embed_vmem[...])                   # (N, N) f32, raw
            ge = _double_center(ge, n)                        # batch-mean center
            es = _hsic_center(ge, n, _offdiag_mask(n))
            esim_ref[...] = es
            fro_e_ref[0] = jnp.sum(es * es)

        # ---- streamed K-tile: accumulate the *uncentered* gram contribution
        # on the MXU (f32 accumulation); centering happens once in finalize.
        x = feats_ref[...]                                    # (N, TK) compute dtype
        if mask_tail:
            # Tail columns of the last tile read past D1; zero them so they
            # contribute nothing (no wrapper-side jnp.pad copy of feats).
            lane = lax.broadcasted_iota(jnp.int32, (n, tk), 1)
            valid = d1 - k * tk                               # >= tk for non-last tiles
            x = jnp.where(lane < valid, x, jnp.zeros_like(x))
        acc_ref[...] += _gram_xxt(x)

        # ---- finalize: center feats gram, combine with precomputed embed_sim.
        @pl.when(k == pl.num_programs(0) - 1)
        def _finalize():
            gf = _double_center(acc_ref[...], n)
            cs = _hsic_center(gf, n, _offdiag_mask(n))
            es = esim_ref[...]
            # Fused single pass over the two centered grams.
            fro_f = jnp.sum(cs * cs)
            dot_fe = jnp.sum(cs * es)
            # dot / (||cs||*||es||) == dot * rsqrt(fro_f*fro_e): one EUP op.
            cka = dot_fe * lax.rsqrt(fro_f * fro_e_ref[0])
            target = target_ref[0]
            loss = jnp.maximum(jnp.float32(0.0), target - cka) ** 2
            cka_ref[0] = cka
            loss_ref[0] = loss

    return kernel


# ------------------------------------------------------------------ wrapper --
def _vmem_budget_bytes():
    """~75% of this generation's physical per-core VMEM (48 MiB on v7x,
    96 MiB on v5e/v6e); falls back to the most restrictive assumption."""
    cap = 64 * 1024 * 1024
    try:
        info_cap = int(pltpu.get_tpu_info().vmem_capacity_bytes)
        if info_cap > 0:
            cap = info_cap
    except Exception:
        pass
    return (cap * 3) // 4


def cka_pallas(feats2d, embed2d, target, *, compute_dtype=jnp.bfloat16,
               max_block_k=None, target_block_bytes=1 << 20):
    """CKA + hinge loss between gram(feats) and gram(embed) on TPU.

    feats2d: (N, D1) -- streamed / K-tiled over D1 (the HBM-bound operand)
    embed2d: (N, D2) -- small, fetched once into VMEM
    target : scalar
    """
    n, d1 = feats2d.shape
    assert embed2d.shape[0] == n
    assert n >= 3, "unbiased-HSIC centering needs n >= 3"
    d2 = embed2d.shape[1]
    itemsize = jnp.dtype(compute_dtype).itemsize

    feats2d = feats2d.astype(compute_dtype)
    embed2d = embed2d.astype(compute_dtype)

    # --- generation-aware VMEM budget & K-tile sizing ------------------------
    budget = _vmem_budget_bytes()
    margin = 4 * 1024 * 1024                         # Mosaic internal scratch etc.
    fixed = 2 * n * n * 4 + n * d2 * itemsize + margin
    if fixed >= budget:
        # TODO(synk): row-tile the (N, N) gram (output grid axis / core split)
        # for very large N so the accumulators need not be fully VMEM-resident.
        raise ValueError(
            f"N={n} too large for resident (N,N) gram accumulators within the "
            f"{budget >> 20} MiB VMEM budget")

    # Size the streamed block so each grid step moves ~target_block_bytes
    # (amortizes the ~0.35us/step pipeline overhead), capped by what fits
    # double-buffered inside the VMEM budget and by the padded D1 extent.
    tk_cap = ((budget - fixed) // (2 * n * itemsize)) // 128 * 128
    if tk_cap < 128:
        raise ValueError("VMEM budget too small for a 128-wide feats tile")
    tk = _round_up(max(1, target_block_bytes // (n * itemsize)), 128)
    tk = min(tk, tk_cap, _round_up(d1, 128))
    if max_block_k is not None:
        tk = min(tk, max(128, (max_block_k // 128) * 128))
    tk = max(tk, 128)
    grid = (pl.cdiv(d1, tk),)

    # TODO(synk): on v7x, split the D1 reduction across the 2 TensorCores
    # (leading "parallel" grid axis producing per-core partial grams + a tiny
    # combine/finalize pass) for ~2x on the streaming phase.
    kernel = _make_cka_kernel(n, d1, tk)
    cka, loss = pl.pallas_call(
        kernel,
        grid=grid,
        out_shape=(jax.ShapeDtypeStruct((1,), jnp.float32),
                   jax.ShapeDtypeStruct((1,), jnp.float32)),
        in_specs=[
            pl.BlockSpec(memory_space=pltpu.MemorySpace.SMEM),  # target scalar
            pl.BlockSpec((n, tk), lambda k: (0, k)),            # feats K-tile (streamed)
            pl.BlockSpec(memory_space=pl.ANY),                  # embed stays in HBM
        ],
        out_specs=(pl.BlockSpec(memory_space=pltpu.MemorySpace.SMEM),
                   pl.BlockSpec(memory_space=pltpu.MemorySpace.SMEM)),
        scratch_shapes=[
            pltpu.VMEM((n, n), jnp.float32),      # uncentered feats gram accumulator
            pltpu.VMEM((n, n), jnp.float32),      # centered embed_sim (from k==0)
            pltpu.VMEM((n, d2), compute_dtype),   # embed, fetched once at k==0
            pltpu.SMEM((1,), jnp.float32),        # ||embed_sim||_F^2
        ],
        compiler_params=pltpu.CompilerParams(
            dimension_semantics=("arbitrary",),   # K is a reduction axis
            vmem_limit_bytes=budget),
    )(jnp.asarray(target, jnp.float32).reshape(1), feats2d, embed2d)
    return cka[0], loss[0]


# --------------------------------------------------------------------- glue --
def pool_feats(feats, pool_size):
    # Matches nn.functional.adaptive_avg_pool2d for the evenly-divisible case,
    # then `reshape(N, -1)` (row-major, NCHW layout).
    if feats.ndim > 2 and pool_size is not None:
        N, C, H, W = feats.shape
        p = pool_size
        assert H % p == 0 and W % p == 0  # TODO(synk): uneven adaptive pooling bins not implemented
        feats = feats.reshape(N, C, p, H // p, p, W // p).mean(axis=(3, 5))
    return feats.reshape(feats.shape[0], -1)


class ViCoWordEmbeddingsPallas:
    """JAX/Pallas port of ViCoWordEmbeddings (forward only).

    The frozen embedding table is initialized deterministically in-script;
    load_embeddings (h5py/json I/O) is out of scope.
    """

    def __init__(self, num_classes, vico_mode="vico_linear", one_hot=False,
                 linear_dim=100, no_hypernym=False, no_glove=False,
                 pool_size=None, key=None, compute_dtype=jnp.bfloat16,
                 max_block_k=None):
        self.num_classes = num_classes
        self.pool_size = pool_size
        self.one_hot = one_hot
        self.compute_dtype = compute_dtype
        self.max_block_k = max_block_k
        if one_hot:
            self.embed_dims = num_classes
            self.embed_weight = jnp.eye(num_classes, dtype=jnp.float32)
        else:
            glove_dim = 300
            embed_dims = glove_dim
            if vico_mode == "vico_linear":
                embed_dims += linear_dim
            elif vico_mode == "vico_select":
                embed_dims += 200
            else:
                raise ValueError("Unknown embedding type:{}".format(vico_mode))
            if no_glove:
                embed_dims -= glove_dim
            if no_hypernym:
                embed_dims -= 50
            self.embed_dims = embed_dims
            key = jax.random.PRNGKey(0) if key is None else key
            self.embed_weight = jax.random.normal(
                key, (num_classes, embed_dims), dtype=jnp.float32)

    def forward(self, feats, label_idxs, target):
        feats2d = pool_feats(feats, self.pool_size).astype(jnp.float32)
        embed = jnp.take(self.embed_weight, label_idxs, axis=0)   # index_select
        cka, loss = cka_pallas(feats2d, embed, target,
                               compute_dtype=self.compute_dtype,
                               max_block_k=self.max_block_k)
        return cka, loss

    __call__ = forward


# --------------------------------------------------------------- reference --
def _ref_cka2d(feats2d, embed2d, target):
    feats = feats2d - jnp.mean(feats2d, axis=0, keepdims=True)
    embed = embed2d - jnp.mean(embed2d, axis=0, keepdims=True)

    def center_gram(g):
        n = g.shape[0]
        g = g - jnp.diag(jnp.diag(g))
        means = jnp.sum(g, axis=0) / (n - 2)
        means = means - jnp.sum(means) / (2 * (n - 1))
        g = g - means[:, None] - means[None, :]
        g = g - jnp.diag(jnp.diag(g))
        return g

    cs = center_gram(feats @ feats.T)
    es = center_gram(embed @ embed.T)
    cn = jnp.sqrt(jnp.sum(cs * cs))
    en = jnp.sqrt(jnp.sum(es * es))
    cka = jnp.sum(cs * es) / (cn * en)
    loss = jnp.maximum(0.0, target - cka) ** 2
    return cka, loss


def _ref_forward(feats, embed_weight, label_idxs, target, pool_size):
    feats2d = pool_feats(feats, pool_size).astype(jnp.float32)
    embed = jnp.take(embed_weight, label_idxs, axis=0)
    return _ref_cka2d(feats2d, embed, target)


# --------------------------------------------------------------------- main --
if __name__ == "__main__":
    key = jax.random.PRNGKey(0)
    k_feats, k_idx, k_embed, k_b = jax.random.split(key, 4)

    # Config A: D1 = C*p*p = 256 -> single auto-sized K tile of 256.
    N, C, H, W = 8, 64, 4, 4
    num_classes = 16
    pool_size = 2

    # Valid config: vico_linear(linear_dim=32) with no_glove -> embed_dims=32
    module = ViCoWordEmbeddingsPallas(
        num_classes=num_classes, vico_mode="vico_linear", linear_dim=32,
        no_glove=True, pool_size=pool_size, key=k_embed,
        compute_dtype=jnp.bfloat16)

    feats = jax.random.normal(k_feats, (N, C, H, W), dtype=jnp.float32)
    label_idxs = jax.random.randint(k_idx, (N,), 0, num_classes, dtype=jnp.int32)
    target = jnp.float32(0.5)

    cka_ref, loss_ref = _ref_forward(feats, module.embed_weight, label_idxs,
                                     target, pool_size)

    # ---- exact-semantics check: f32 compute path, tight tolerance.
    module.compute_dtype = jnp.float32
    cka32, loss32 = module(feats, label_idxs, target)
    cka32, loss32 = jax.block_until_ready((cka32, loss32))
    np.testing.assert_allclose(np.asarray(cka32), np.asarray(cka_ref),
                               rtol=1e-3, atol=1e-5)
    np.testing.assert_allclose(np.asarray(loss32), np.asarray(loss_ref),
                               rtol=1e-3, atol=1e-5)

    # ---- fast path (default): bf16 MXU inputs, f32 gram accumulation and
    # all centering / norms in f32.
    module.compute_dtype = jnp.bfloat16
    cka16, loss16 = module(feats, label_idxs, target)
    cka16, loss16 = jax.block_until_ready((cka16, loss16))
    np.testing.assert_allclose(np.asarray(cka16), np.asarray(cka_ref),
                               rtol=5e-2, atol=3e-2)
    np.testing.assert_allclose(np.asarray(loss16), np.asarray(loss_ref),
                               rtol=5e-2, atol=3e-2)

    # ---- Config B: multi-tile streamed grid with a non-divisible D1 tail
    # (400 = 3*128 + 16) -> exercises the K pipeline and the in-kernel tail
    # mask (no wrapper jnp.pad copy).
    feats_b = jax.random.normal(k_b, (N, 400), dtype=jnp.float32)
    embed_b = jnp.take(module.embed_weight, label_idxs, axis=0)
    cka_b, loss_b = cka_pallas(feats_b, embed_b, target,
                               compute_dtype=jnp.float32, max_block_k=128)
    cka_b, loss_b = jax.block_until_ready((cka_b, loss_b))
    cka_b_ref, loss_b_ref = _ref_cka2d(feats_b, embed_b, target)
    np.testing.assert_allclose(np.asarray(cka_b), np.asarray(cka_b_ref),
                               rtol=1e-3, atol=1e-5)
    np.testing.assert_allclose(np.asarray(loss_b), np.asarray(loss_b_ref),
                               rtol=1e-3, atol=1e-5)

    print("KERNEL_OK")
</pallas_src>

<mosaic_0001>
module attributes {stable_mosaic.version = 11 : i64} {
  func.func @kernel(%arg0: i32, %arg1: memref<1xf32, #tpu.memory_space<smem>>, %arg2: memref<8x256xf32, #tpu.memory_space<vmem>>, %arg3: memref<8x32xf32, #tpu.memory_space<any>>, %arg4: memref<1xf32, #tpu.memory_space<smem>>, %arg5: memref<1xf32, #tpu.memory_space<smem>>, %arg6: memref<8x8xf32, #tpu.memory_space<vmem>>, %arg7: memref<8x8xf32, #tpu.memory_space<vmem>>, %arg8: memref<8x32xf32, #tpu.memory_space<vmem>>, %arg9: memref<1xf32, #tpu.memory_space<smem>>) attributes {dimension_semantics = [#tpu.dimension_semantics<arbitrary>], iteration_bounds = array<i64: 1>, scalar_prefetch = 0 : i64, scratch_operands = 4 : i64, tpu.core_type = #tpu.core_type<tc>, window_params = [{transform_indices = @transform_0, window_bounds = array<i64: 1>}, {transform_indices = @transform_1, window_bounds = array<i64: 8, 256>}, {}, {transform_indices = @transform_3, window_bounds = array<i64: 1>}, {transform_indices = @transform_4, window_bounds = array<i64: 1>}]} {
    %c0_i32 = arith.constant 0 : i32
    %0 = arith.cmpi eq, %arg0, %c0_i32 : i32
    %1 = arith.extui %0 : i1 to i32
    %c0_i32_0 = arith.constant 0 : i32
    %2 = arith.cmpi ne, %1, %c0_i32_0 : i32
    scf.if %2 {
      %cst_8 = arith.constant 0.000000e+00 : f32
      %11 = vector.broadcast %cst_8 : f32 to vector<8x8xf32>
      %c0_9 = arith.constant 0 : index
      %c0_10 = arith.constant 0 : index
      %12 = vector.load %arg6[%c0_9, %c0_10] : memref<8x8xf32, #tpu.memory_space<vmem>>, vector<8x8xf32>
      tpu.vector_store %arg6[%c0_9, %c0_10], %11 {strides = array<i32>} : memref<8x8xf32, #tpu.memory_space<vmem>>, vector<8x8xf32>,
      "tpu.region"() ({
        %69 = tpu.sem_alloc : memref<!tpu.dma_semaphore, #tpu.memory_space<semaphore_mem>>
        tpu.enqueue_dma source(%arg3 : memref<8x32xf32, #tpu.memory_space<any>>) target(%arg8 : memref<8x32xf32, #tpu.memory_space<vmem>>) target_semaphore(%69 : memref<!tpu.dma_semaphore, #tpu.memory_space<semaphore_mem>>)
        tpu.wait_dma2 semaphore(%69 : memref<!tpu.dma_semaphore, #tpu.memory_space<semaphore_mem>>) src(%arg3 : memref<8x32xf32, #tpu.memory_space<any>>) dst(%arg8 : memref<8x32xf32, #tpu.memory_space<vmem>>)
        tpu.yield
      }) : () -> ()
      %c0_11 = arith.constant 0 : index
      %c0_12 = arith.constant 0 : index
      %13 = vector.load %arg8[%c0_11, %c0_12] : memref<8x32xf32, #tpu.memory_space<vmem>>, vector<8x32xf32>
      %cst_13 = arith.constant dense<0.000000e+00> : vector<8x8xf32>
      %14 = tpu.matmul %13, %13, %cst_13 {dimension_numbers = #tpu.dot_dimension_numbers<[1], [1], [0], [0], [0, 0, 1, 0], [], []>} : vector<8x32xf32>, vector<8x32xf32>, vector<8x8xf32> -> vector<8x8xf32>
      %cst_14 = arith.constant dense<0.000000e+00> : vector<8xf32>
      %15 = vector.multi_reduction <add>, %14, %cst_14 [0] : vector<8x8xf32> to vector<8xf32>
      %16 = vector.shape_cast %15 : vector<8xf32> to vector<1x8xf32>
      %cst_15 = arith.constant 8.000000e+00 : f32
      %17 = vector.broadcast %cst_15 : f32 to vector<1x8xf32>
      %18 = arith.divf %16, %17 : vector<1x8xf32>
      %cst_16 = arith.constant dense<0.000000e+00> : vector<8xf32>
      %19 = vector.multi_reduction <add>, %14, %cst_16 [1] : vector<8x8xf32> to vector<8xf32>
      %20 = vector.shape_cast %19 : vector<8xf32> to vector<8x1xf32>
      %cst_17 = arith.constant 8.000000e+00 : f32
      %21 = vector.broadcast %cst_17 : f32 to vector<8x1xf32>
      %22 = arith.divf %20, %21 : vector<8x1xf32>
      %23 = vector.shape_cast %18 : vector<1x8xf32> to vector<1x1x8xf32>
      %cst_18 = arith.constant dense<0.000000e+00> : vector<1xf32>
      %24 = vector.multi_reduction <add>, %23, %cst_18 [1, 2] : vector<1x1x8xf32> to vector<1xf32>
      %25 = vector.shape_cast %24 : vector<1xf32> to vector<1x1x1xf32>
      %26 = vector.extract %25[0, 0, 0] : f32 from vector<1x1x1xf32>
      %cst_19 = arith.constant 8.000000e+00 : f32
      %27 = arith.divf %26, %cst_19 : f32
      %28 = vector.broadcast %22 : vector<8x1xf32> to vector<8x8xf32>
      %29 = arith.subf %14, %28 : vector<8x8xf32>
      %30 = vector.broadcast %18 : vector<1x8xf32> to vector<8x8xf32>
      %31 = arith.subf %29, %30 : vector<8x8xf32>
      %32 = vector.broadcast %27 : f32 to vector<8x8xf32>
      %33 = arith.addf %31, %32 : vector<8x8xf32>
      %34 = tpu.iota {dimensions = array<i32: 0>} : vector<8x8xi32>
      %35 = tpu.iota {dimensions = array<i32: 1>} : vector<8x8xi32>
      %36 = arith.cmpi ne, %34, %35 : vector<8x8xi32>
      %37 = arith.extui %36 : vector<8x8xi1> to vector<8x8xi32>
      %38 = arith.sitofp %37 : vector<8x8xi32> to vector<8x8xf32>
      %39 = arith.mulf %33, %38 : vector<8x8xf32>
      %cst_20 = arith.constant dense<0.000000e+00> : vector<8xf32>
      %40 = vector.multi_reduction <add>, %39, %cst_20 [0] : vector<8x8xf32> to vector<8xf32>
      %41 = vector.shape_cast %40 : vector<8xf32> to vector<1x8xf32>
      %cst_21 = arith.constant 6.000000e+00 : f32
      %42 = vector.broadcast %cst_21 : f32 to vector<1x8xf32>
      %43 = arith.divf %41, %42 : vector<1x8xf32>
      %cst_22 = arith.constant dense<0.000000e+00> : vector<8xf32>
      %44 = vector.multi_reduction <add>, %39, %cst_22 [1] : vector<8x8xf32> to vector<8xf32>
      %45 = vector.shape_cast %44 : vector<8xf32> to vector<8x1xf32>
      %cst_23 = arith.constant 6.000000e+00 : f32
      %46 = vector.broadcast %cst_23 : f32 to vector<8x1xf32>
      %47 = arith.divf %45, %46 : vector<8x1xf32>
      %48 = vector.shape_cast %43 : vector<1x8xf32> to vector<1x1x8xf32>
      %cst_24 = arith.constant dense<0.000000e+00> : vector<1xf32>
      %49 = vector.multi_reduction <add>, %48, %cst_24 [1, 2] : vector<1x1x8xf32> to vector<1xf32>
      %50 = vector.shape_cast %49 : vector<1xf32> to vector<1x1x1xf32>
      %51 = vector.extract %50[0, 0, 0] : f32 from vector<1x1x1xf32>
      %cst_25 = arith.constant 1.400000e+01 : f32
      %52 = arith.divf %51, %cst_25 : f32
      %53 = vector.broadcast %52 : f32 to vector<8x1xf32>
      %54 = arith.subf %47, %53 : vector<8x1xf32>
      %55 = vector.broadcast %54 : vector<8x1xf32> to vector<8x8xf32>
      %56 = arith.subf %39, %55 : vector<8x8xf32>
      %57 = vector.broadcast %52 : f32 to vector<1x8xf32>
      %58 = arith.subf %43, %57 : vector<1x8xf32>
      %59 = vector.broadcast %58 : vector<1x8xf32> to vector<8x8xf32>
      %60 = arith.subf %56, %59 : vector<8x8xf32>
      %61 = arith.mulf %60, %38 : vector<8x8xf32>
      %c0_26 = arith.constant 0 : index
      %c0_27 = arith.constant 0 : index
      %62 = vector.load %arg7[%c0_26, %c0_27] : memref<8x8xf32, #tpu.memory_space<vmem>>, vector<8x8xf32>
      tpu.vector_store %arg7[%c0_26, %c0_27], %61 {strides = array<i32>} : memref<8x8xf32, #tpu.memory_space<vmem>>, vector<8x8xf32>,
      %63 = arith.mulf %61, %61 : vector<8x8xf32>
      %64 = vector.shape_cast %63 : vector<8x8xf32> to vector<1x8x8xf32>
      %cst_28 = arith.constant dense<0.000000e+00> : vector<1xf32>
      %65 = vector.multi_reduction <add>, %64, %cst_28 [1, 2] : vector<1x8x8xf32> to vector<1xf32>
      %66 = vector.shape_cast %65 : vector<1xf32> to vector<1x1x1xf32>
      %67 = vector.extract %66[0, 0, 0] : f32 from vector<1x1x1xf32>
      %c0_29 = arith.constant 0 : index
      %68 = memref.load %arg9[%c0_29] : memref<1xf32, #tpu.memory_space<smem>>
      memref.store %67, %arg9[%c0_29] : memref<1xf32, #tpu.memory_space<smem>>
    } else {
    }
    %c0 = arith.constant 0 : index
    %c0_1 = arith.constant 0 : index
    %3 = vector.load %arg2[%c0, %c0_1] : memref<8x256xf32, #tpu.memory_space<vmem>>, vector<8x256xf32>
    %c0_2 = arith.constant 0 : index
    %c0_3 = arith.constant 0 : index
    %4 = vector.load %arg6[%c0_2, %c0_3] : memref<8x8xf32, #tpu.memory_space<vmem>>, vector<8x8xf32>
    %cst = arith.constant dense<0.000000e+00> : vector<8x8xf32>
    %5 = tpu.matmul %3, %3, %cst {dimension_numbers = #tpu.dot_dimension_numbers<[1], [1], [0], [0], [0, 0, 1, 0], [], []>} : vector<8x256xf32>, vector<8x256xf32>, vector<8x8xf32> -> vector<8x8xf32>
    %6 = arith.addf %4, %5 : vector<8x8xf32>
    %c0_4 = arith.constant 0 : index
    %c0_5 = arith.constant 0 : index
    %7 = vector.load %arg6[%c0_4, %c0_5] : memref<8x8xf32, #tpu.memory_space<vmem>>, vector<8x8xf32>
    tpu.vector_store %arg6[%c0_4, %c0_5], %6 {strides = array<i32>} : memref<8x8xf32, #tpu.memory_space<vmem>>, vector<8x8xf32>,
    %c0_i32_6 = arith.constant 0 : i32
    %8 = arith.cmpi eq, %arg0, %c0_i32_6 : i32
    %9 = arith.extui %8 : i1 to i32
    %c0_i32_7 = arith.constant 0 : i32
    %10 = arith.cmpi ne, %9, %c0_i32_7 : i32
    scf.if %10 {
      %c0_8 = arith.constant 0 : index
      %c0_9 = arith.constant 0 : index
      %11 = vector.load %arg6[%c0_8, %c0_9] : memref<8x8xf32, #tpu.memory_space<vmem>>, vector<8x8xf32>
      %cst_10 = arith.constant dense<0.000000e+00> : vector<8xf32>
      %12 = vector.multi_reduction <add>, %11, %cst_10 [0] : vector<8x8xf32> to vector<8xf32>
      %13 = vector.shape_cast %12 : vector<8xf32> to vector<1x8xf32>
      %cst_11 = arith.constant 8.000000e+00 : f32
      %14 = vector.broadcast %cst_11 : f32 to vector<1x8xf32>
      %15 = arith.divf %13, %14 : vector<1x8xf32>
      %cst_12 = arith.constant dense<0.000000e+00> : vector<8xf32>
      %16 = vector.multi_reduction <add>, %11, %cst_12 [1] : vector<8x8xf32> to vector<8xf32>
      %17 = vector.shape_cast %16 : vector<8xf32> to vector<8x1xf32>
      %cst_13 = arith.constant 8.000000e+00 : f32
      %18 = vector.broadcast %cst_13 : f32 to vector<8x1xf32>
      %19 = arith.divf %17, %18 : vector<8x1xf32>
      %20 = vector.shape_cast %15 : vector<1x8xf32> to vector<1x1x8xf32>
      %cst_14 = arith.constant dense<0.000000e+00> : vector<1xf32>
      %21 = vector.multi_reduction <add>, %20, %cst_14 [1, 2] : vector<1x1x8xf32> to vector<1xf32>
      %22 = vector.shape_cast %21 : vector<1xf32> to vector<1x1x1xf32>
      %23 = vector.extract %22[0, 0, 0] : f32 from vector<1x1x1xf32>
      %cst_15 = arith.constant 8.000000e+00 : f32
      %24 = arith.divf %23, %cst_15 : f32
      %25 = vector.broadcast %19 : vector<8x1xf32> to vector<8x8xf32>
      %26 = arith.subf %11, %25 : vector<8x8xf32>
      %27 = vector.broadcast %15 : vector<1x8xf32> to vector<8x8xf32>
      %28 = arith.subf %26, %27 : vector<8x8xf32>
      %29 = vector.broadcast %24 : f32 to vector<8x8xf32>
      %30 = arith.addf %28, %29 : vector<8x8xf32>
      %31 = tpu.iota {dimensions = array<i32: 0>} : vector<8x8xi32>
      %32 = tpu.iota {dimensions = array<i32: 1>} : vector<8x8xi32>
      %33 = arith.cmpi ne, %31, %32 : vector<8x8xi32>
      %34 = arith.extui %33 : vector<8x8xi1> to vector<8x8xi32>
      %35 = arith.sitofp %34 : vector<8x8xi32> to vector<8x8xf32>
      %36 = arith.mulf %30, %35 : vector<8x8xf32>
      %cst_16 = arith.constant dense<0.000000e+00> : vector<8xf32>
      %37 = vector.multi_reduction <add>, %36, %cst_16 [0] : vector<8x8xf32> to vector<8xf32>
      %38 = vector.shape_cast %37 : vector<8xf32> to vector<1x8xf32>
      %cst_17 = arith.constant 6.000000e+00 : f32
      %39 = vector.broadcast %cst_17 : f32 to vector<1x8xf32>
      %40 = arith.divf %38, %39 : vector<1x8xf32>
      %cst_18 = arith.constant dense<0.000000e+00> : vector<8xf32>
      %41 = vector.multi_reduction <add>, %36, %cst_18 [1] : vector<8x8xf32> to vector<8xf32>
      %42 = vector.shape_cast %41 : vector<8xf32> to vector<8x1xf32>
      %cst_19 = arith.constant 6.000000e+00 : f32
      %43 = vector.broadcast %cst_19 : f32 to vector<8x1xf32>
      %44 = arith.divf %42, %43 : vector<8x1xf32>
      %45 = vector.shape_cast %40 : vector<1x8xf32> to vector<1x1x8xf32>
      %cst_20 = arith.constant dense<0.000000e+00> : vector<1xf32>
      %46 = vector.multi_reduction <add>, %45, %cst_20 [1, 2] : vector<1x1x8xf32> to vector<1xf32>
      %47 = vector.shape_cast %46 : vector<1xf32> to vector<1x1x1xf32>
      %48 = vector.extract %47[0, 0, 0] : f32 from vector<1x1x1xf32>
      %cst_21 = arith.constant 1.400000e+01 : f32
      %49 = arith.divf %48, %cst_21 : f32
      %50 = vector.broadcast %49 : f32 to vector<8x1xf32>
      %51 = arith.subf %44, %50 : vector<8x1xf32>
      %52 = vector.broadcast %51 : vector<8x1xf32> to vector<8x8xf32>
      %53 = arith.subf %36, %52 : vector<8x8xf32>
      %54 = vector.broadcast %49 : f32 to vector<1x8xf32>
      %55 = arith.subf %40, %54 : vector<1x8xf32>
      %56 = vector.broadcast %55 : vector<1x8xf32> to vector<8x8xf32>
      %57 = arith.subf %53, %56 : vector<8x8xf32>
      %58 = arith.mulf %57, %35 : vector<8x8xf32>
      %c0_22 = arith.constant 0 : index
      %c0_23 = arith.constant 0 : index
      %59 = vector.load %arg7[%c0_22, %c0_23] : memref<8x8xf32, #tpu.memory_space<vmem>>, vector<8x8xf32>
      %60 = arith.mulf %58, %58 : vector<8x8xf32>
      %61 = vector.shape_cast %60 : vector<8x8xf32> to vector<1x8x8xf32>
      %cst_24 = arith.constant dense<0.000000e+00> : vector<1xf32>
      %62 = vector.multi_reduction <add>, %61, %cst_24 [1, 2] : vector<1x8x8xf32> to vector<1xf32>
      %63 = vector.shape_cast %62 : vector<1xf32> to vector<1x1x1xf32>
      %64 = vector.extract %63[0, 0, 0] : f32 from vector<1x1x1xf32>
      %65 = arith.mulf %58, %59 : vector<8x8xf32>
      %66 = vector.shape_cast %65 : vector<8x8xf32> to vector<1x8x8xf32>
      %cst_25 = arith.constant dense<0.000000e+00> : vector<1xf32>
      %67 = vector.multi_reduction <add>, %66, %cst_25 [1, 2] : vector<1x8x8xf32> to vector<1xf32>
      %68 = vector.shape_cast %67 : vector<1xf32> to vector<1x1x1xf32>
      %69 = vector.extract %68[0, 0, 0] : f32 from vector<1x1x1xf32>
      %c0_26 = arith.constant 0 : index
      %70 = memref.load %arg9[%c0_26] : memref<1xf32, #tpu.memory_space<smem>>
      %71 = arith.mulf %64, %70 : f32
      %72 = math.rsqrt %71 : f32
      %73 = arith.mulf %69, %72 : f32
      %c0_27 = arith.constant 0 : index
      %74 = memref.load %arg1[%c0_27] : memref<1xf32, #tpu.memory_space<smem>>
      %75 = arith.subf %74, %73 : f32
      %cst_28 = arith.constant 0.000000e+00 : f32
      %76 = arith.maximumf %cst_28, %75 : f32
      %77 = arith.mulf %76, %76 : f32
      %c0_29 = arith.constant 0 : index
      %78 = memref.load %arg4[%c0_29] : memref<1xf32, #tpu.memory_space<smem>>
      memref.store %73, %arg4[%c0_29] : memref<1xf32, #tpu.memory_space<smem>>
      %c0_30 = arith.constant 0 : index
      %79 = memref.load %arg5[%c0_30] : memref<1xf32, #tpu.memory_space<smem>>
      memref.store %77, %arg5[%c0_30] : memref<1xf32, #tpu.memory_space<smem>>
    } else {
    }
    return
  }
  func.func @transform_0(%arg0: i32) -> i32 {
    %c0_i32 = arith.constant 0 : i32
    %c0_i32_0 = arith.constant 0 : i32
    return %c0_i32 : i32
  }
  func.func @transform_1(%arg0: i32) -> (i32, i32) {
    %c0_i32 = arith.constant 0 : i32
    %c0_i32_0 = arith.constant 0 : i32
    return %c0_i32, %arg0 : i32, i32
  }
  func.func @transform_3(%arg0: i32) -> i32 {
    %c0_i32 = arith.constant 0 : i32
    %c0_i32_0 = arith.constant 0 : i32
    return %c0_i32 : i32
  }
  func.func @transform_4(%arg0: i32) -> i32 {
    %c0_i32 = arith.constant 0 : i32
    %c0_i32_0 = arith.constant 0 : i32
    return %c0_i32 : i32
  }
}

</mosaic_0001>

<bundles_post_ra>
// kernel: tpu_custom_call.1
= control target key start
LH: loop header
LB: loop body
LE: loop exit
PB: predicated region body
PF: predicated region fallthrough
CT: control target
= control target key end

     0   :  { %11 = vsyncpa [#allocation8], 0  ;;  %s637_s0 = inlined_call_operand.<no memory space> [shape: f32[1], index: 0, kind: input, shape index: {}]   ;;  %s638_s1 = inlined_call_operand.hbm [shape: f32[8,256], index: 1, kind: input, shape index: {}]   ;;  %s639_s2 = inlined_call_operand.hbm [shape: f32[8,32], index: 2, kind: input, shape index: {}]   ;;  %s640_s3 = inlined_call_operand.hbm [shape: f32[1], index: 3, kind: output, shape index: {0}]   ;;  %s641_s4 = inlined_call_operand.hbm [shape: f32[1], index: 4, kind: output, shape index: {1}]  }
   0x1   :  { %12 = vsyncpa [#allocation9], 0 }
   0x2   :  { %13 = vsyncpa [#allocation12], 0  ;;  %s527_s15 = smov [#allocation7]   ;;  %s455_s19 = scalar_lea.hbm %s638_s1, 256 }
   0x3   :  { %s22_s16 = sshll.u32 %s527_s15, 4  ;;  %p456_p0 = scmp.ne.s32.totalorder %s638_s1, %s455_s19  ;;  %s23_s16 = int_to_ptr.vmem [resolvable:$true] %s22_s16 }
   0x4   :  { %p459_p1 = scmp.lt.u32.totalorder %s455_s19, %s638_s1 }
   0x6   :  { %p461_p2 = pnand %p459_p1, %p456_p0 }
   0x8   :  { %464 = shalt.err (!%p461_p2)
}
   0x9   :  { %s465_s24 = scalar_lea.vmem %s23_s16, 256  ;;  %p470_p4 = scmp.lt.s32.totalorder %s23_s16, %s23_s16 }
   0xa   :  { %p466_p3 = scmp.ne.s32.totalorder %s23_s16, %s465_s24  ;;  %p471_p5 = scmp.lt.s32.totalorder %s465_s24, %s465_s24 }
   0xc   :  { %p472_p6 = por %p471_p5, %p470_p4 }
   0xe   :  { %p473_p7 = pnand %p472_p6, %p466_p3 }
  0x10   :  { %476 = shalt.err (!%p473_p7)
}
  0x11   :  { %25 = dma.hbm_to_vmem [thread:$0]  %s638_s1, 256, %s23_s16, [#allocation8]  }
  0x12   :  { %519 = dma.done.wait [#allocation8], 256  }
  0x13   :  { %520 = vsyncadd [#allocation8], 4294967040  ;;  %vm33_vm0 = vcmask 64512   ;;  %v528_v0 = vmov 0.0  }
  0x14   :  { %34 = vst.msk [vmem:[#allocation2] sm:$0xff] %vm33_vm0, %v528_v0 }
  0x15   :  { %s529_s27 = smov [#allocation4]   ;;  %s477_s5 = scalar_lea.hbm %s639_s2, 128 }
  0x16   :  { %s42_s28 = sshll.u32 %s529_s27, 4  ;;  %p478_p8 = scmp.ne.s32.totalorder %s639_s2, %s477_s5  ;;  %s43_s28 = int_to_ptr.vmem [resolvable:$true] %s42_s28 }
  0x17   :  { %p481_p9 = scmp.lt.u32.totalorder %s477_s5, %s639_s2 }
  0x19   :  { %p483_p10 = pnand %p481_p9, %p478_p8 }
  0x1b   :  { %486 = shalt.err (!%p483_p10)  }
  0x1c   :  { %s487_s9 = scalar_lea.vmem %s43_s28, 128  ;;  %p492_p12 = scmp.lt.s32.totalorder %s43_s28, %s43_s28 }
  0x1d   :  { %p488_p11 = scmp.ne.s32.totalorder %s43_s28, %s487_s9  ;;  %p493_p13 = scmp.lt.s32.totalorder %s487_s9, %s487_s9 }
  0x1f   :  { %p494_p0 = por %p493_p13, %p492_p12 }
  0x21   :  { %p495_p1 = pnand %p494_p0, %p488_p11 }
  0x23   :  { %498 = shalt.err (!%p495_p1)  }
  0x24   :  { %45 = dma.hbm_to_vmem [thread:$0]  %s639_s2, 128, %s43_s28, [#allocation13] }
  0x25   :  { %521 = dma.done.wait [#allocation13], 128 }
  0x26   :  { %522 = vsyncadd [#allocation13], 4294967168  ;;  %425 = vmatprep.subr.mxu0 %v528_v0  ;;  %v49_v1 = vld [vmem:[#allocation4] sm:$0xff]  ;;  %vm50_vm1 = vcmask 261120   ;;  %vm530_vm2 = vmmov 0   ;;  %vm136_vm3 = vcmask 57344   ;;  %v154_v23 = vlaneseq }
  0x27   :  { %426 = vmatpush3.xpose.msk.msra.mxu0 %vm50_vm1, %v49_v1  ;;  %427 = vmatprep.mubr.msk.f32.mxu0 %vm530_vm2, %v528_v0  ;;  %v208_v13 = vld [vmem:[#allocation7 + $0x8] sm:$0xff]  ;;  %v207_v14 = vld [vmem:[#allocation7] sm:$0xff]  ;;  %s499_s30 = scalar_lea.hbm %s640_s3, 16 }
  0x28   :  { %210 = vmatprep.subr.mxu1 %v208_v13  ;;  %274 = vmatprep.mubr.f32.mxu1 %v208_v13  ;;  %v155_v25 = vshrl.u32 %v154_v23, 7  ;;  %v157_v26 = vand.u32 127, %v154_v23  ;;  %v209_v42 = vld [vmem:[#allocation2] sm:$0xff]  ;;  %p500_p2 = scmp.ne.s32.totalorder %s640_s3, %s499_s30  ;;  %p503_p3 = scmp.lt.u32.totalorder %s499_s30, %s640_s3 }
  0x29   :  { %211 = vmatpush1.xpose.msra.mxu1 %v207_v14 }
  0x2a   :  { %428 = vmatmul.mubr.msk.f32.vlgmr.msra.gmra.mrb[0].mxu0 %vm50_vm1, %v49_v1  ;;  %vm158_vm4 = vcmp.ne.s32.totalorder %v155_v25, %v157_v26  ;;  %p505_p4 = pnand %p503_p3, %p500_p2 }
  0x2b   :  { %v590_v30 = vsel %vm158_vm4, 1.0, %v528_v0 }
  0x2c   :  { %275 = vmatmul.mubr.f32.vlgmr.msra.gmra.mrb[0].mxu1 %v207_v14 }
  0xfd   :  { %v120_v2 = vpop.f32.mrb[0].mxu0 }
  0xfe   :  { %v124_v3 = vsel %vm33_vm0, %v120_v2, 0.0  ;;  %v429_v4 = vpop.f32.mrb[1].mxu0 }
  0xff   :  { %v125_v5 = vrot.slane %v124_v3, 4  ;;  %v276_v43 = vpop.f32.mrb[0].mxu1 }
 0x100   :  { %v280_v44 = vadd.f32 %v276_v43, %v209_v42  ;;  %v278_v45 = vpop.f32.mrb[1].mxu1 }
 0x101   :  { %v126_v6 = vadd.f32 %v125_v5, %v124_v3 }
 0x102   :  { %282 = vst.msk [vmem:[#allocation2] sm:$0xff] %vm33_vm0, %v280_v44 }
 0x103   :  { %v127_v7 = vrot.slane %v126_v6, 2 }
 0x105   :  { %v128_v8 = vadd.f32 %v127_v7, %v126_v6 }
 0x107   :  { %v129_v9 = vrot.slane %v128_v8, 1 }
 0x109   :  { %v130_v10 = vadd.f32 %v129_v9, %v128_v8  ;;  %v286_v46 = vld [vmem:[#allocation2] sm:$0xff] }
 0x10a   :  { %v287_v47 = vsel %vm33_vm0, %v286_v46, 0.0 }
 0x10b   :  { %v132_v11 = vmul.f32 0.125, %v130_v10  ;;  %v288_v48 = vrot.slane %v287_v47, 4 }
 0x10d   :  { %v137_v12 = vsel %vm136_vm3, %v132_v11, 0.0  ;;  %v289_v49 = vadd.f32 %v288_v48, %v287_v47 }
 0x10e   :  { %138 = vadd.xlane.f32.xlu0 %v137_v12 }
 0x10f   :  { %v290_v50 = vrot.slane %v289_v49, 2 }
 0x111   :  { %v291_v51 = vadd.f32 %v290_v50, %v289_v49 }
 0x112   :  { %133 = vadd.xlane.f32.xlu0 %v124_v3 }
 0x113   :  { %v292_v52 = vrot.slane %v291_v51, 1 }
 0x115   :  { %v293_v53 = vadd.f32 %v292_v52, %v291_v51 }
 0x117   :  { %v295_v54 = vmul.f32 0.125, %v293_v53 }
 0x119   :  { %v300_v55 = vsel %vm136_vm3, %v295_v54, 0.0 }
 0x19b   :  { %v139_v15 = vpop.xlane.xlu0 %138 }
 0x19c   :  { %v140_v16 = vrot.slane %v139_v15, 4 }
 0x19e   :  { %v141_v17 = vadd.f32 %v140_v16, %v139_v15 }
 0x19f   :  { %v134_v22 = vpop.xlane.xlu0 %133 }
 0x1a0   :  { %v142_v18 = vrot.slane %v141_v17, 2  ;;  %v135_v24 = vmul.f32 0.125, %v134_v22 }
 0x1a2   :  { %v143_v19 = vadd.f32 %v142_v18, %v141_v17  ;;  %v150_v27 = vsub.f32 %v120_v2, %v135_v24 }
 0x1a4   :  { %v144_v20 = vrot.slane %v143_v19, 1  ;;  %v151_v28 = vsub.f32 %v150_v27, %v132_v11 }
 0x1a6   :  { %v145_v21 = vadd.f32 %v144_v20, %v143_v19 }
 0x1a8   :  { %430 = vpush %v145_v21 }
 0x1d9   :  { %s431_s2 = spop %430 }
 0x1da   :  { %s149_s12 = smul.f32 0.125, %s431_s2 }
 0x1dc   :  { %v152_v29 = vstv %s149_s12 }
 0x1dd   :  { %v153_v31 = vadd.f32 %v152_v29, %v151_v28 }
 0x1df   :  { %v161_v32 = vmul.f32 %v590_v30, %v153_v31 }
 0x1e1   :  { %v162_v33 = vsel %vm33_vm0, %v161_v32, 0.0 }
 0x1e2   :  { %v163_v34 = vrot.slane %v162_v33, 4 }
 0x1e4   :  { %v164_v35 = vadd.f32 %v163_v34, %v162_v33 }
 0x1e6   :  { %v165_v36 = vrot.slane %v164_v35, 2 }
 0x1e8   :  { %v166_v37 = vadd.f32 %v165_v36, %v164_v35 }
 0x1ea   :  { %v167_v38 = vrot.slane %v166_v37, 1 }
 0x1ec   :  { %v168_v39 = vadd.f32 %v167_v38, %v166_v37 }
 0x1ee   :  { %v170_v40 = vmul.f32 0.16666667, %v168_v39 }
 0x1f0   :  { %v174_v41 = vsel %vm136_vm3, %v170_v40, 0.0 }
 0x1f1   :  { %175 = vadd.xlane.f32.xlu1 %v174_v41 }
 0x1f5   :  { %171 = vadd.xlane.f32.xlu1 %v162_v33 }
 0x1f9   :  { %301 = vadd.xlane.f32.xlu1 %v300_v55 }
 0x27e   :  { %v176_v56 = vpop.xlane.xlu1 %175 }
 0x27f   :  { %v177_v57 = vrot.slane %v176_v56, 4 }
 0x281   :  { %v178_v58 = vadd.f32 %v177_v57, %v176_v56 }
 0x282   :  { %v172_v63 = vpop.xlane.xlu1 %171 }
 0x283   :  { %v179_v59 = vrot.slane %v178_v58, 2  ;;  %v173_v0 = vmul.f32 0.16666667, %v172_v63 }
 0x285   :  { %v180_v60 = vadd.f32 %v179_v59, %v178_v58 }
 0x286   :  { %v302_v9 = vpop.xlane.xlu1 %301 }
 0x287   :  { %v181_v61 = vrot.slane %v180_v60, 1  ;;  %v303_v10 = vrot.slane %v302_v9, 4 }
 0x289   :  { %v182_v62 = vadd.f32 %v181_v61, %v180_v60  ;;  %v304_v11 = vadd.f32 %v303_v10, %v302_v9 }
 0x28b   :  { %432 = vpush %v182_v62  ;;  %v305_v12 = vrot.slane %v304_v11, 2 }
 0x28d   :  { %v306_v16 = vadd.f32 %v305_v12, %v304_v11 }
 0x28f   :  { %v307_v19 = vrot.slane %v306_v16, 1 }
 0x291   :  { %v308_v22 = vadd.f32 %v307_v19, %v306_v16 }
 0x2bc   :  { %s433_s13 = spop %432 }
 0x2bd   :  { %s186_s14 = smul.f32 0.071428575, %s433_s13 }
 0x2bf   :  { %v187_v1 = vstv %s186_s14 }
 0x2c0   :  { %v188_v2 = vsub.f32 %v173_v0, %v187_v1  ;;  %v190_v4 = vsub.f32 %v170_v40, %v187_v1 }
 0x2c2   :  { %v189_v3 = vsub.f32 %v161_v32, %v188_v2 }
 0x2c4   :  { %v191_v5 = vsub.f32 %v189_v3, %v190_v4 }
 0x2c6   :  { %v192_v6 = vmul.f32 %v590_v30, %v191_v5 }
 0x2c8   :  { %v194_v7 = vmul.f32 %v192_v6, %v192_v6  ;;  %193 = vst.msk [vmem:[#allocation3] sm:$0xff] %vm33_vm0, %v192_v6 }
 0x2ca   :  { %v195_v8 = vsel %vm33_vm0, %v194_v7, 0.0 }
 0x2cb   :  { %196 = vadd.xlane.f32.xlu0 %v195_v8 }
 0x2cf   :  { %296 = vadd.xlane.f32.xlu0 %v287_v47  ;;  %v356_v55 = vld [vmem:[#allocation3] sm:$0xff] }
 0x358   :  { %v197_v13 = vpop.xlane.xlu0 %196 }
 0x359   :  { %v198_v14 = vrot.slane %v197_v13, 4 }
 0x35b   :  { %v199_v15 = vadd.f32 %v198_v14, %v197_v13 }
 0x35c   :  { %v297_v23 = vpop.xlane.xlu0 %296 }
 0x35d   :  { %v200_v17 = vrot.slane %v199_v15, 2  ;;  %v298_v24 = vmul.f32 0.125, %v297_v23 }
 0x35f   :  { %v201_v18 = vadd.f32 %v200_v17, %v199_v15  ;;  %v313_v25 = vsub.f32 %v286_v46, %v298_v24 }
 0x361   :  { %v202_v20 = vrot.slane %v201_v18, 1  ;;  %v314_v26 = vsub.f32 %v313_v25, %v295_v54 }
 0x363   :  { %v203_v21 = vadd.f32 %v202_v20, %v201_v18 }
 0x365   :  { %434 = vpush %v203_v21 }
 0x366   :  { %436 = vpush %v308_v22 }
 0x396   :  { %s601_s15 = spop %434 }
 0x397   :  { %s437_s16 = spop %436 }
 0x398   :  { %s312_s17 = smul.f32 0.125, %s437_s16 }
 0x39a   :  { %v315_v27 = vstv %s312_s17 }
 0x39b   :  { %v316_v28 = vadd.f32 %v315_v27, %v314_v26 }
 0x39d   :  { %v324_v29 = vmul.f32 %v590_v30, %v316_v28 }
 0x39f   :  { %v325_v31 = vsel %vm33_vm0, %v324_v29, 0.0 }
 0x3a0   :  { %334 = vadd.xlane.f32.xlu0 %v325_v31  ;;  %v326_v32 = vrot.slane %v325_v31, 4 }
 0x3a2   :  { %v327_v33 = vadd.f32 %v326_v32, %v325_v31 }
 0x3a4   :  { %v328_v34 = vrot.slane %v327_v33, 2 }
 0x3a6   :  { %v329_v35 = vadd.f32 %v328_v34, %v327_v33 }
 0x3a8   :  { %v330_v36 = vrot.slane %v329_v35, 1 }
 0x3aa   :  { %v331_v37 = vadd.f32 %v330_v36, %v329_v35 }
 0x3ac   :  { %v333_v38 = vmul.f32 0.16666667, %v331_v37 }
 0x3ae   :  { %v337_v39 = vsel %vm136_vm3, %v333_v38, 0.0 }
 0x3af   :  { %338 = vadd.xlane.f32.xlu1 %v337_v39 }
 0x42d   :  { %v335_v47 = vpop.xlane.xlu0 %334 }
 0x42e   :  { %v336_v48 = vmul.f32 0.16666667, %v335_v47 }
 0x43c   :  { %v339_v40 = vpop.xlane.xlu1 %338 }
 0x43d   :  { %v340_v41 = vrot.slane %v339_v40, 4 }
 0x43f   :  { %v341_v42 = vadd.f32 %v340_v41, %v339_v40 }
 0x441   :  { %v342_v43 = vrot.slane %v341_v42, 2 }
 0x443   :  { %v343_v44 = vadd.f32 %v342_v43, %v341_v42 }
 0x445   :  { %v344_v45 = vrot.slane %v343_v44, 1 }
 0x447   :  { %v345_v46 = vadd.f32 %v344_v45, %v343_v44 }
 0x449   :  { %438 = vpush %v345_v46 }
 0x47a   :  { %s439_s18 = spop %438 }
 0x47b   :  { %s349_s19 = smul.f32 0.071428575, %s439_s18 }
 0x47d   :  { %v350_v49 = vstv %s349_s19 }
 0x47e   :  { %v351_v50 = vsub.f32 %v336_v48, %v350_v49  ;;  %v353_v52 = vsub.f32 %v333_v38, %v350_v49 }
 0x480   :  { %v352_v51 = vsub.f32 %v324_v29, %v351_v50 }
 0x482   :  { %v354_v53 = vsub.f32 %v352_v51, %v353_v52 }
 0x484   :  { %v355_v54 = vmul.f32 %v590_v30, %v354_v53 }
 0x486   :  { %v368_v56 = vmul.f32 %v356_v55, %v355_v54  ;;  %v357_v57 = vmul.f32 %v355_v54, %v355_v54 }
 0x488   :  { %v369_v58 = vsel %vm33_vm0, %v368_v56, 0.0  ;;  %v358_v59 = vsel %vm33_vm0, %v357_v57, 0.0 }
 0x489   :  { %370 = vadd.xlane.f32.xlu0 %v369_v58  ;;  %359 = vadd.xlane.f32.xlu1 %v358_v59 }
 0x516   :  { %v371_v60 = vpop.xlane.xlu0 %370  ;;  %v360_v61 = vpop.xlane.xlu1 %359 }
 0x517   :  { %v372_v62 = vrot.slane %v371_v60, 4  ;;  %v361_v63 = vrot.slane %v360_v61, 4 }
 0x519   :  { %v373_v0 = vadd.f32 %v372_v62, %v371_v60  ;;  %v362_v1 = vadd.f32 %v361_v63, %v360_v61 }
 0x51b   :  { %v374_v2 = vrot.slane %v373_v0, 2  ;;  %v363_v3 = vrot.slane %v362_v1, 2 }
 0x51d   :  { %v375_v4 = vadd.f32 %v374_v2, %v373_v0  ;;  %v364_v30 = vadd.f32 %v363_v3, %v362_v1 }
 0x51f   :  { %v365_v5 = vrot.slane %v364_v30, 1  ;;  %v376_v6 = vrot.slane %v375_v4, 1 }
 0x521   :  { %v366_v7 = vadd.f32 %v365_v5, %v364_v30  ;;  %v377_v8 = vadd.f32 %v376_v6, %v375_v4 }
 0x523   :  { %440 = vpush %v366_v7 }
 0x524   :  { %442 = vpush %v377_v8 }
 0x554   :  { %s441_s20 = spop %440 }
 0x555   :  { %s380_s21 = smul.f32 %s441_s20, %s601_s15  ;;  %s443_s22 = spop %442 }
 0x557   :  { %v381_v9 = vstv %s380_s21 }
 0x558   :  { %453 = vrsqrt.f32 %v381_v9 }
 0x562   :  { %v454_v10 = vpop.eup %453 }
 0x563   :  { %444 = vpush %v454_v10 }
 0x594   :  { %s445_s23 = spop %444 }
 0x595   :  { %s384_s24 = smul.f32 %s445_s23, %s443_s22 }
 0x597   :  { %s386_s27 = ssub.f32 %s637_s0, %s384_s24 }
 0x598   :  { %390 = sst [smem:[#allocation10]] %s384_s24 }
 0x599   :  { %508 = shalt.err (!%p505_p4)
}
 0x59a   :  { %s531_s1 = smov [#allocation10]   ;;  %s532_s0 = smov 0.0  }
 0x59b   :  { %400 = dma.smem_to_hbm %s531_s1, 16, %s640_s3, [#allocation9]  }
 0x59c   :  { %s387_s11 = smax.f32 %s532_s0, %s386_s27  ;;  %s509_s14 = scalar_lea.hbm %s641_s4, 16 }
 0x59d   :  { %s388_s2 = smul.f32 %s387_s11, %s387_s11  ;;  %p510_p5 = scmp.ne.s32.totalorder %s641_s4, %s509_s14 }
 0x59e   :  { %p513_p6 = scmp.lt.u32.totalorder %s509_s14, %s641_s4 }
 0x59f   :  { %392 = sst [smem:[#allocation11]] %s388_s2 }
 0x5a0   :  { %p515_p7 = pnand %p513_p6, %p510_p5 }
 0x5a2   :  { %518 = shalt.err (!%p515_p7)
}
 0x5a3   :  { %s533_s19 = smov [#allocation11]  }
 0x5a4   :  { %408 = dma.smem_to_hbm %s533_s19, 16, %s641_s4, [#allocation12]  }
 0x5a5   :  { %523 = dma.done.wait [#allocation9], 16  }
 0x5a6   :  { %524 = vsyncadd [#allocation9], 4294967280 }
 0x5a7   :  { %525 = dma.done.wait [#allocation12], 16  }
 0x5a8   :  { %526 = vsyncadd [#allocation12], 4294967280 }
 0x5a9   :  { %415 = sfence }
 0x5aa   :  { %416 = vsyncpa [#allocation8], 1 }
 0x5ab   :  { %417 = vsyncpa [#allocation9], 1 }
 0x5ac   :  { %418 = vsyncpa [#allocation12], 1 }

</bundles_post_ra>
